<compile_context>
chip_gen: v7x
topology: tpu7x:2x2x1
jax: 0.10.0
libtpu: 0.0.40
codegen_flags: <defaults>
</compile_context>

<pallas_src>
import numpy as np
import jax
import jax.numpy as jnp
from jax.experimental import pallas as pl
from jax.experimental.pallas import tpu as pltpu

LATENT_DIM = 40
TILE_ROWS = 1024        # row tile: multiple of 8; ~1 KiB/row (lane-padded) in+out
                        # -> double-buffered well under every generation's VMEM default
MIN_PALLAS_ROWS = 512   # below this, pallas_call is pure launch overhead -> fall back


# ------------------------------- Pallas kernel -------------------------------

def linear_kernel(x_ref, w_ref, b_ref, o_ref):
    # x: (TR, D)   w: (D, D) pre-transposed (in, out)   b: (1, D)
    o_ref[...] = (jnp.dot(x_ref[...], w_ref[...],
                          preferred_element_type=jnp.float32)
                  + b_ref[...]).astype(o_ref.dtype)


# ----------------------------- params & packing ------------------------------

def init_params(key):
    """PyTorch-layout nn.Linear(D, D) params: weight (out, in), bias (out,)."""
    D = LATENT_DIM
    kw, kb = jax.random.split(key)
    bound = 1.0 / np.sqrt(D)
    return {
        'fc_w': jax.random.uniform(kw, (D, D), jnp.float32, -bound, bound),
        'fc_b': jax.random.uniform(kb, (D,), jnp.float32, -bound, bound),
    }


def pack_params(params):
    """Pre-pack ONCE (hoisted out of the forward): W -> (in, out), b -> (1, D)."""
    D = LATENT_DIM
    return {
        'w_t': jnp.asarray(params['fc_w']).T,            # (D_in, D_out)
        'b': jnp.asarray(params['fc_b']).reshape(1, D),
    }


# --------------------------------- forward -----------------------------------

def _round_up(x, m):
    return ((x + m - 1) // m) * m


def _pallas_linear(x2, w_t, b):
    R, D = x2.shape
    tr = min(TILE_ROWS, _round_up(R, 8))      # multiple of 8; no oversized blocks for small R
    grid = (pl.cdiv(R, tr),)
    cost = pl.CostEstimate(
        flops=2 * R * D * D,
        bytes_accessed=R * D * 4 * 2 + D * D * 4 + D * 4,
        transcendentals=0,
    )
    return pl.pallas_call(
        linear_kernel,
        out_shape=jax.ShapeDtypeStruct((R, D), x2.dtype),
        grid=grid,
        in_specs=[
            pl.BlockSpec((tr, D), lambda i: (i, 0)),   # row-tiled, auto double-buffered
            pl.BlockSpec((D, D), lambda i: (0, 0)),    # weight resident across steps
            pl.BlockSpec((1, D), lambda i: (0, 0)),    # bias resident across steps
        ],
        out_specs=pl.BlockSpec((tr, D), lambda i: (i, 0)),
        compiler_params=pltpu.CompilerParams(
            dimension_semantics=("parallel",)),        # megacore split on v7x
        cost_estimate=cost,
    )(x2, w_t, b)


def latent_to_prompt_forward(packed, latents, *, force_pallas=False):
    """y = latents @ W.T + b.  Any leading batch dims."""
    D = latents.shape[-1]
    lead = latents.shape[:-1]
    x2 = latents.reshape(-1, D)                # fold all leading dims into rows
    R = x2.shape[0]

    if force_pallas or R >= MIN_PALLAS_ROWS:
        out = _pallas_linear(x2, packed['w_t'], packed['b'])
    else:
        # Tiny R: pallas_call fixed cost dominates; XLA's fused dot is at least as fast.
        out = x2 @ packed['w_t'] + packed['b']

    return out.reshape(*lead, D)


def reference_forward(params, latents):
    """Pure-JAX reference with PyTorch nn.Linear semantics."""
    return latents @ params['fc_w'].T + params['fc_b']


# ----------------------------------- main -------------------------------------

if __name__ == "__main__":
    key = jax.random.PRNGKey(0)
    kp, kx1, kx2 = jax.random.split(key, 3)

    params = init_params(kp)
    packed = pack_params(params)               # packed once, reused every forward

    # 1) Small spec-sized input, forced through the Pallas kernel (single grid step).
    B, S = 2, 8
    latents_small = jax.random.normal(kx1, (B, S, LATENT_DIM), jnp.float32)
    out_small = jax.block_until_ready(
        latent_to_prompt_forward(packed, latents_small, force_pallas=True))
    assert out_small.shape == (B, S, LATENT_DIM)
    assert bool(jnp.all(jnp.isfinite(out_small)))
    np.testing.assert_allclose(np.asarray(out_small),
                               np.asarray(reference_forward(params, latents_small)),
                               rtol=1e-5, atol=1e-5)

    # 2) Larger input exercising the row-tiled, pipelined multi-step grid path.
    B2, S2 = 8, 256                            # R = 2048 rows -> 2 grid steps at TR=1024
    latents_big = jax.random.normal(kx2, (B2, S2, LATENT_DIM), jnp.float32)
    out_big = jax.block_until_ready(latent_to_prompt_forward(packed, latents_big))
    assert out_big.shape == (B2, S2, LATENT_DIM)
    np.testing.assert_allclose(np.asarray(out_big),
                               np.asarray(reference_forward(params, latents_big)),
                               rtol=1e-5, atol=1e-5)

    # 3) Tiny-R default path (fallback to fused XLA dot), same semantics.
    out_fb = jax.block_until_ready(latent_to_prompt_forward(packed, latents_small))
    np.testing.assert_allclose(np.asarray(out_fb),
                               np.asarray(reference_forward(params, latents_small)),
                               rtol=1e-5, atol=1e-5)

    print("KERNEL_OK")
</pallas_src>

<mosaic_0001>
module attributes {stable_mosaic.version = 11 : i64} {
  func.func @linear_kernel(%arg0: i32, %arg1: memref<16x40xf32, #tpu.memory_space<vmem>>, %arg2: memref<40x40xf32, #tpu.memory_space<vmem>>, %arg3: memref<1x40xf32, #tpu.memory_space<vmem>>, %arg4: memref<16x40xf32, #tpu.memory_space<vmem>>) attributes {dimension_semantics = [#tpu.dimension_semantics<parallel>], iteration_bounds = array<i64: 1>, scalar_prefetch = 0 : i64, scratch_operands = 0 : i64, tpu.core_type = #tpu.core_type<tc>, window_params = [{transform_indices = @transform_0, window_bounds = array<i64: 16, 40>}, {pipeline_mode = #tpu.pipeline_mode<synchronous>, transform_indices = @transform_1, window_bounds = array<i64: 40, 40>}, {pipeline_mode = #tpu.pipeline_mode<synchronous>, transform_indices = @transform_2, window_bounds = array<i64: 1, 40>}, {transform_indices = @transform_3, window_bounds = array<i64: 16, 40>}]} {
    %c0 = arith.constant 0 : index
    %c0_0 = arith.constant 0 : index
    %0 = vector.load %arg1[%c0, %c0_0] : memref<16x40xf32, #tpu.memory_space<vmem>>, vector<16x40xf32>
    %c0_1 = arith.constant 0 : index
    %c0_2 = arith.constant 0 : index
    %1 = vector.load %arg2[%c0_1, %c0_2] : memref<40x40xf32, #tpu.memory_space<vmem>>, vector<40x40xf32>
    %cst = arith.constant dense<0.000000e+00> : vector<16x40xf32>
    %2 = tpu.matmul %0, %1, %cst {dimension_numbers = #tpu.dot_dimension_numbers<[1], [0], [0], [1], [0, 0, 1, 1], [], []>} : vector<16x40xf32>, vector<40x40xf32>, vector<16x40xf32> -> vector<16x40xf32>
    %c0_3 = arith.constant 0 : index
    %c0_4 = arith.constant 0 : index
    %3 = vector.load %arg3[%c0_3, %c0_4] : memref<1x40xf32, #tpu.memory_space<vmem>>, vector<1x40xf32>
    %4 = vector.broadcast %3 : vector<1x40xf32> to vector<16x40xf32>
    %5 = arith.addf %2, %4 : vector<16x40xf32>
    %c0_5 = arith.constant 0 : index
    %c0_6 = arith.constant 0 : index
    %6 = vector.load %arg4[%c0_5, %c0_6] : memref<16x40xf32, #tpu.memory_space<vmem>>, vector<16x40xf32>
    tpu.vector_store %arg4[%c0_5, %c0_6], %5 {strides = array<i32>} : memref<16x40xf32, #tpu.memory_space<vmem>>, vector<16x40xf32>,
    return
  }
  func.func @transform_0(%arg0: i32) -> (i32, i32) {
    %c0_i32 = arith.constant 0 : i32
    %c0_i32_0 = arith.constant 0 : i32
    return %arg0, %c0_i32 : i32, i32
  }
  func.func @transform_1(%arg0: i32) -> (i32, i32) {
    %c0_i32 = arith.constant 0 : i32
    %c0_i32_0 = arith.constant 0 : i32
    %c0_i32_1 = arith.constant 0 : i32
    return %c0_i32, %c0_i32_0 : i32, i32
  }
  func.func @transform_2(%arg0: i32) -> (i32, i32) {
    %c0_i32 = arith.constant 0 : i32
    %c0_i32_0 = arith.constant 0 : i32
    %c0_i32_1 = arith.constant 0 : i32
    return %c0_i32, %c0_i32_0 : i32, i32
  }
  func.func @transform_3(%arg0: i32) -> (i32, i32) {
    %c0_i32 = arith.constant 0 : i32
    %c0_i32_0 = arith.constant 0 : i32
    return %arg0, %c0_i32 : i32, i32
  }
}

</mosaic_0001>

<bundles_post_ra>
// kernel: tpu_custom_call.1
= control target key start
LH: loop header
LB: loop body
LE: loop exit
PB: predicated region body
PF: predicated region fallthrough
CT: control target
= control target key end

     0   :  { %8 = vsyncpa [#allocation3], 0  ;;  %s344_s0 = inlined_call_operand.hbm [shape: f32[16,40], index: 0, kind: input, shape index: {}]   ;;  %s345_s1 = inlined_call_operand.hbm [shape: f32[40,40], index: 1, kind: input, shape index: {}]   ;;  %s346_s2 = inlined_call_operand.vmem [shape: f32[1,40], index: 2, kind: input, shape index: {}]   ;;  %s347_s3 = inlined_call_operand.hbm [shape: f32[16,40], index: 3, kind: output, shape index: {}]  }
   0x1   :  { %9 = vsyncpa [#allocation6], 0 }
   0x2   :  { %10 = vsyncpa [#allocation4], 0  ;;  %s267_s12 = smov [#allocation2]   ;;  %s195_s16 = scalar_lea.hbm %s344_s0, 256 }
   0x3   :  { %s16_s13 = sshll.u32 %s267_s12, 4  ;;  %p196_p0 = scmp.ne.s32.totalorder %s344_s0, %s195_s16  ;;  %s17_s13 = int_to_ptr.vmem [resolvable:$true] %s16_s13 }
   0x4   :  { %p199_p1 = scmp.lt.u32.totalorder %s195_s16, %s344_s0 }
   0x6   :  { %p201_p2 = pnand %p199_p1, %p196_p0 }
   0x8   :  { %204 = shalt.err (!%p201_p2)
}
   0x9   :  { %s205_s21 = scalar_lea.vmem %s17_s13, 256  ;;  %p210_p4 = scmp.lt.s32.totalorder %s17_s13, %s17_s13 }
   0xa   :  { %p206_p3 = scmp.ne.s32.totalorder %s17_s13, %s205_s21  ;;  %p211_p5 = scmp.lt.s32.totalorder %s205_s21, %s205_s21 }
   0xc   :  { %p212_p6 = por %p211_p5, %p210_p4 }
   0xe   :  { %p213_p7 = pnand %p212_p6, %p206_p3 }
  0x10   :  { %216 = shalt.err (!%p213_p7)
}
  0x11   :  { %s268_s22 = smov 128   ;;  %s269_s23 = smov 8  }
  0x12   :  { %22 = dma.hbm_to_vmem [thread:$0]  %s344_s0, 256, %s17_s13, [#allocation3], %s268_s22, %s268_s22, %s269_s23  }
  0x13   :  { %s270_s26 = smov [#allocation5]   ;;  %s217_s30 = scalar_lea.hbm %s345_s1, 640 }
  0x14   :  { %s28_s27 = sshll.u32 %s270_s26, 4  ;;  %p218_p8 = scmp.ne.s32.totalorder %s345_s1, %s217_s30  ;;  %s29_s27 = int_to_ptr.vmem [resolvable:$true] %s28_s27 }
  0x15   :  { %p221_p9 = scmp.lt.u32.totalorder %s217_s30, %s345_s1 }
  0x17   :  { %p223_p10 = pnand %p221_p9, %p218_p8 }
  0x19   :  { %226 = shalt.err (!%p223_p10)
}
  0x1a   :  { %s227_s8 = scalar_lea.vmem %s29_s27, 640  ;;  %p232_p12 = scmp.lt.s32.totalorder %s29_s27, %s29_s27 }
  0x1b   :  { %p228_p11 = scmp.ne.s32.totalorder %s29_s27, %s227_s8  ;;  %p233_p13 = scmp.lt.s32.totalorder %s227_s8, %s227_s8 }
  0x1d   :  { %p234_p0 = por %p233_p13, %p232_p12 }
  0x1f   :  { %p235_p1 = pnand %p234_p0, %p228_p11 }
  0x21   :  { %238 = shalt.err (!%p235_p1)
}
  0x22   :  { %34 = dma.hbm_to_vmem [thread:$0]  %s345_s1, 640, %s29_s27, [#allocation6], %s268_s22, %s268_s22, %s269_s23  }
  0x23   :  { %261 = dma.done.wait [#allocation3], 256  }
  0x24   :  { %262 = vsyncadd [#allocation3], 4294967040 }
  0x25   :  { %263 = dma.done.wait [#allocation6], 640  }
  0x26   :  { %264 = vsyncadd [#allocation6], 4294966656  ;;  %vm57_vm0 = vcmask 326656   ;;  %v45_v0 = vld [vmem:[#allocation5] sm:$0xff]  ;;  %v46_v1 = vld [vmem:[#allocation5 + $0x8] sm:$0xff]  ;;  %s271_s11 = smov [#allocation7]  }
  0x27   :  { %v47_v2 = vld [vmem:[#allocation5 + $0x10] sm:$0xff]  ;;  %v182_v3 = vpack.c.bf16 %v46_v1, %v45_v0  ;;  %v48_v4 = vld [vmem:[#allocation5 + $0x18] sm:$0xff]  ;;  %v49_v7 = vld [vmem:[#allocation5 + $0x20] sm:$0xff]  ;;  %s146_s12 = sshll.u32 %s271_s11, 4  ;;  %s147_s12 = int_to_ptr.vmem [resolvable:$true] %s146_s12 }
  0x28   :  { %v43_v5 = vld [vmem:[#allocation2] sm:$0xff]  ;;  %v186_v6 = vpack.c.bf16 %v48_v4, %v47_v2  ;;  %v44_v8 = vld [vmem:[#allocation2 + $0x8] sm:$0xff]  ;;  %s239_s13 = scalar_lea.vmem %s147_s12, 256  ;;  %p244_p3 = scmp.lt.s32.totalorder %s147_s12, %s147_s12 }
  0x29   :  { %179 = vmatprep.mubr.msk.f32.mxu0 %vm57_vm0, %v43_v5  ;;  %183 = vmatprep.subr.bf16.mxu0 %v182_v3  ;;  %v159_v9 = vld [vmem:[%s346_s2] ss:$0 sm:$0xff]  ;;  %p240_p2 = scmp.ne.s32.totalorder %s147_s12, %s239_s13  ;;  %p245_p4 = scmp.lt.s32.totalorder %s239_s13, %s239_s13 }
  0x2a   :  { %185 = vmatpush3.bf16.msra.mxu0 %v182_v3 }
  0x2b   :  { %187 = vmatprep.subr.bf16.mxu0 %v186_v6  ;;  %p246_p5 = por %p245_p4, %p244_p3 }
  0x2d   :  { %p247_p6 = pnand %p246_p5, %p240_p2 }
  0x2e   :  { %189 = vmatpush3.bf16.msra.mxu0 %v186_v6 }
  0x2f   :  { %177 = vmatprep.subr.mxu0 %v49_v7 }
  0x32   :  { %178 = vmatpush3.msra.mxu0 %v49_v7 }
  0x33   :  { %180 = vmatmul.mubr.msk.f32.vlgmr.msra.gmra.mrb[0].mxu0 %vm57_vm0, %v44_v8 }
 0x106   :  { %v181_v10 = vpop.f32.mrb[0].mxu0 }
 0x107   :  { %v136_v11 = vadd.f32 %v181_v10, %v159_v9  ;;  %v130_v12 = vpop.f32.mrb[1].mxu0 }
 0x108   :  { %v131_v13 = vadd.f32 %v159_v9, %v130_v12 }
 0x109   :  { %140 = vst.msk [vmem:[#allocation7 + $0x8] sm:$0xff] %vm57_vm0, %v136_v11 }
 0x10a   :  { %139 = vst.msk [vmem:[#allocation7] sm:$0xff] %vm57_vm0, %v131_v13 }
 0x10b   :  { %250 = shalt.err (!%p247_p6)
}
 0x10c   :  { %s251_s15 = scalar_lea.hbm %s347_s3, 256 }
 0x10d   :  { %p252_p7 = scmp.ne.s32.totalorder %s347_s3, %s251_s15  ;;  %p255_p8 = scmp.lt.u32.totalorder %s251_s15, %s347_s3 }
 0x10f   :  { %p257_p9 = pnand %p255_p8, %p252_p7 }
 0x111   :  { %260 = shalt.err (!%p257_p9)
}
 0x112   :  { %152 = dma.vmem_to_hbm [thread:$0]  %s147_s12, 256, %s347_s3, [#allocation4], %s268_s22, %s268_s22, %s269_s23  }
 0x113   :  { %265 = dma.done.wait [#allocation4], 256  }
 0x114   :  { %266 = vsyncadd [#allocation4], 4294967040 }
 0x115   :  { %156 = vsyncpa [#allocation3], 1 }
 0x116   :  { %157 = vsyncpa [#allocation6], 1 }
 0x117   :  { %158 = vsyncpa [#allocation4], 1 }

</bundles_post_ra>
